<compile_context>
chip_gen: v7x
topology: tpu7x:2x2x1
jax: 0.10.0
libtpu: 0.0.40
codegen_flags: <defaults>
</compile_context>

<pallas_src>
import functools

import jax
import jax.numpy as jnp
from jax.experimental import pallas as pl
from jax.experimental.pallas import tpu as pltpu

_LANE = 128


def _round_up(x, m):
    return ((x + m - 1) // m) * m


def _pick_tile(dim, candidates, min_tile=1):
    """Pick the candidate tile minimizing padded size (prefer larger on ties),
    restricted to tiles >= min_tile when possible."""
    cands = [t for t in candidates if t >= min_tile]
    if not cands:
        cands = [max(candidates)]
    best_t, best_pad = None, None
    for t in cands:
        p = _round_up(dim, t)
        if best_pad is None or p < best_pad or (p == best_pad and t > best_t):
            best_t, best_pad = t, p
    return best_t


@functools.lru_cache(maxsize=None)
def _tpu_config():
    """Generation-aware VMEM budget and tile caps."""
    vmem_cap = 64 * 1024 * 1024  # conservative default (v7x per-TC VMEM)
    try:
        info = pltpu.get_tpu_info()
        vmem_cap = int(getattr(info, "vmem_capacity_bytes", vmem_cap))
    except Exception:
        pass
    if vmem_cap >= 96 * 1024 * 1024:
        # v5e / v6e: 128 MiB physical VMEM.  Default scoped limit (16/32 MiB)
        # is too small for the biggest fused tiles -> raise it explicitly and
        # allow a larger fused-K / wider tn.
        return dict(vmem_limit=96 * 1024 * 1024, k_fuse_max=4096,
                    tn_cands=(1024, 512, 256, 128),
                    tk_cands=(1024, 512, 256, 128))
    # v7x: 64 MiB physical per TensorCore; keep the double-buffered footprint
    # comfortably under ~48 MiB.
    return dict(vmem_limit=48 * 1024 * 1024, k_fuse_max=3072,
                tn_cands=(512, 256, 128),
                tk_cands=(1024, 512, 256, 128))


# --------------------------------------------------------------------------
# Kernel bodies
# --------------------------------------------------------------------------
def _mp_linear_fused_kernel(x_ref, w_ref, b_ref, o_ref):
    """Whole-K kernel: one (tm, tn) output tile per grid step, no K axis."""
    # x / w arrive pre-staged in bf16 on every multi-step path (astype is a
    # no-op there); only the single-step (1,1) grid keeps f32 inputs and pays
    # this cast once.
    acc = jnp.dot(x_ref[...].astype(jnp.bfloat16),
                  w_ref[...].astype(jnp.bfloat16),
                  preferred_element_type=jnp.float32)
    # Bias was pre-rounded (bf16 round trip) in the wrapper.  The inner
    # autocast op's output is bf16; the MixedPrecisionModule wrapper then
    # upcasts it to float32.
    o_ref[...] = (acc + b_ref[...]).astype(jnp.bfloat16).astype(jnp.float32)


def _mp_linear_tiled_kernel(x_ref, w_ref, b_ref, o_ref):
    """K-tiled kernel: K innermost, accumulate directly into the resident
    f32 output block (no scratch)."""
    k = pl.program_id(2)

    @pl.when(k == 0)
    def _():
        o_ref[...] = jnp.zeros_like(o_ref)

    o_ref[...] += jnp.dot(x_ref[...].astype(jnp.bfloat16),
                          w_ref[...].astype(jnp.bfloat16),
                          preferred_element_type=jnp.float32)

    @pl.when(k == pl.num_programs(2) - 1)
    def _():
        o_ref[...] = (o_ref[...] + b_ref[...]).astype(jnp.bfloat16).astype(jnp.float32)


# --------------------------------------------------------------------------
# Wrapper
# --------------------------------------------------------------------------
@jax.jit
def mixed_precision_linear(x, weight, bias):
    """Emulates MixedPrecisionModule(nn.Linear(K, N)).forward.

    x:      [M, K] float32
    weight: [K, N] float32
    bias:   [N]    float32
    returns [M, N] float32
    """
    M, K = x.shape
    K2, N = weight.shape
    assert K == K2 and bias.shape == (N,)

    cfg = _tpu_config()

    # ---- tile selection (MXU-shaped, lane-dense, padding-aware) ----
    tm = _pick_tile(M, (256, 128, 64, 32, 16, 8), min_tile=64 if M >= 64 else 8)
    tn = _pick_tile(N, cfg["tn_cands"])
    Kp_lane = _round_up(K, _LANE)
    fuse_k = Kp_lane <= cfg["k_fuse_max"]
    tk = Kp_lane if fuse_k else _pick_tile(K, cfg["tk_cands"], min_tile=512)

    Mp, Np = _round_up(M, tm), _round_up(N, tn)
    Kp = Kp_lane if fuse_k else _round_up(K, tk)
    gm, gn = Mp // tm, Np // tn

    # Guarantee >=2 parallel grid iterations so both v7x TensorCores are used.
    if fuse_k and gm * gn == 1:
        if tn >= 256:
            tn //= 2
        elif tm >= 32:
            tm //= 2
        Mp, Np = _round_up(M, tm), _round_up(N, tn)
        gm, gn = Mp // tm, Np // tn

    gk = 1 if fuse_k else Kp // tk
    steps = gm * gn * gk

    # Stage x / weight to bf16 outside the kernel whenever the grid re-runs
    # (one fused XLA cast+pad pass); keep f32 + in-kernel cast only for a
    # single-step grid.
    stage_bf16 = steps > 1
    if stage_bf16 and tm < 16:          # keep bf16 sublane packing friendly
        tm = 16
        Mp = _round_up(M, tm)
        gm = Mp // tm
        steps = gm * gn * gk

    in_dtype = jnp.bfloat16 if stage_bf16 else jnp.float32
    ebytes = 2 if stage_bf16 else 4

    xp = x.astype(in_dtype)
    if (Mp, Kp) != (M, K):
        xp = jnp.pad(xp, ((0, Mp - M), (0, Kp - K)))
    wp = weight.astype(in_dtype)
    if (Kp, Np) != (K, N):
        wp = jnp.pad(wp, ((0, Kp - K), (0, Np - N)))
    # Pre-round the bias (autocast bf16 round trip) so kernels add it in f32
    # with no per-step casts.
    bp = bias.astype(jnp.bfloat16).astype(jnp.float32)
    if Np != N:
        bp = jnp.pad(bp, (0, Np - N))
    bp = bp.reshape(1, Np)

    make_params = functools.partial(
        pltpu.CompilerParams, vmem_limit_bytes=cfg["vmem_limit"])
    flops = 2 * Mp * Np * Kp

    if fuse_k:
        x_pass = Mp * Kp * ebytes
        w_pass = Kp * Np * ebytes
        i_outer_bytes = x_pass + w_pass * gm   # x resident, w re-streamed gm times
        j_outer_bytes = w_pass + x_pass * gn   # w resident, x re-streamed gn times
        if j_outer_bytes < i_outer_bytes:
            grid = (gn, gm)
            x_spec = pl.BlockSpec((tm, Kp), lambda j, i: (i, 0))
            w_spec = pl.BlockSpec((Kp, tn), lambda j, i: (0, j))
            b_spec = pl.BlockSpec((1, tn), lambda j, i: (0, j))
            o_spec = pl.BlockSpec((tm, tn), lambda j, i: (i, j))
            stream_bytes = j_outer_bytes
        else:
            grid = (gm, gn)
            x_spec = pl.BlockSpec((tm, Kp), lambda i, j: (i, 0))
            w_spec = pl.BlockSpec((Kp, tn), lambda i, j: (0, j))
            b_spec = pl.BlockSpec((1, tn), lambda i, j: (0, j))
            o_spec = pl.BlockSpec((tm, tn), lambda i, j: (i, j))
            stream_bytes = i_outer_bytes
        cost = pl.CostEstimate(
            flops=flops, transcendentals=0,
            bytes_accessed=stream_bytes + Mp * Np * 4 + Np * 4 * gm)
        out = pl.pallas_call(
            _mp_linear_fused_kernel,
            out_shape=jax.ShapeDtypeStruct((Mp, Np), jnp.float32),
            grid_spec=pltpu.PrefetchScalarGridSpec(
                num_scalar_prefetch=0, grid=grid,
                in_specs=[x_spec, w_spec, b_spec], out_specs=o_spec),
            compiler_params=make_params(
                dimension_semantics=("parallel", "parallel")),
            cost_estimate=cost,
        )(xp, wp, bp)
    else:
        grid = (gm, gn, gk)
        cost = pl.CostEstimate(
            flops=flops, transcendentals=0,
            bytes_accessed=(Mp * Kp * ebytes * gn + Kp * Np * ebytes * gm
                            + Np * 4 * gm + Mp * Np * 4))
        out = pl.pallas_call(
            _mp_linear_tiled_kernel,
            out_shape=jax.ShapeDtypeStruct((Mp, Np), jnp.float32),
            grid_spec=pltpu.PrefetchScalarGridSpec(
                num_scalar_prefetch=0, grid=grid,
                in_specs=[
                    pl.BlockSpec((tm, tk), lambda i, j, k: (i, k)),   # x tile
                    pl.BlockSpec((tk, tn), lambda i, j, k: (k, j)),   # w tile
                    pl.BlockSpec((1, tn), lambda i, j, k: (0, j)),    # bias
                ],
                out_specs=pl.BlockSpec((tm, tn), lambda i, j, k: (i, j))),
            compiler_params=make_params(
                dimension_semantics=("parallel", "parallel", "arbitrary")),
            cost_estimate=cost,
        )(xp, wp, bp)

    if (Mp, Np) != (M, N):
        out = out[:M, :N]
    return out


# --------------------------------------------------------------------------
# Self-test
# --------------------------------------------------------------------------
if __name__ == "__main__":
    # TODO(synk): the PyTorch wrapper accepts an arbitrary inner nn.Module; we
    # instantiate the canonical autocast-affected op (nn.Linear) as the spec.

    def reference(x, w, b):
        # bf16-emulated autocast linear, then wrapper upcast to f32.
        acc = jnp.dot(
            x.astype(jnp.bfloat16),
            w.astype(jnp.bfloat16),
            preferred_element_type=jnp.float32,
        )
        y = acc + b.astype(jnp.bfloat16).astype(jnp.float32)[None, :]
        return y.astype(jnp.bfloat16).astype(jnp.float32)

    def check(m, k, n, key):
        kx, kw, kb = jax.random.split(key, 3)
        x = jax.random.normal(kx, (m, k), dtype=jnp.float32)
        w = jax.random.normal(kw, (k, n), dtype=jnp.float32) * 0.05
        b = jax.random.normal(kb, (n,), dtype=jnp.float32) * 0.1
        out = jax.block_until_ready(mixed_precision_linear(x, w, b))
        assert out.dtype == jnp.float32 and out.shape == (m, n)
        ref = reference(x, w, b)
        assert jnp.allclose(out, ref, atol=2e-2, rtol=2e-2), (
            f"mismatch vs reference for shape ({m},{k},{n})"
        )

    key = jax.random.PRNGKey(0)
    keys = jax.random.split(key, 5)

    # Tiny aligned shape -> single-step fused path (f32 inputs, in-kernel cast).
    check(16, 256, 128, keys[0])
    # Ragged shapes -> padding + final slice.
    check(13, 200, 75, keys[1])
    # Tall x -> fused path with swapped (j-outer) grid order + bf16 staging.
    check(1024, 256, 128, keys[2])
    # (1,1)-grid split into two N tiles (keeps both v7x cores busy).
    check(16, 512, 128, keys[3])
    # Large K -> K-tiled path accumulating into the resident output block.
    check(32, 4480, 256, keys[4])

    print("KERNEL_OK")
</pallas_src>

<mosaic_0001>
module attributes {stable_mosaic.version = 11 : i64} {
  func.func @_mp_linear_fused_kernel(%arg0: i32, %arg1: i32, %arg2: memref<16x256xf32, #tpu.memory_space<vmem>>, %arg3: memref<256x128xf32, #tpu.memory_space<vmem>>, %arg4: memref<1x128xf32, #tpu.memory_space<vmem>>, %arg5: memref<16x128xf32, #tpu.memory_space<vmem>>) attributes {dimension_semantics = [#tpu.dimension_semantics<parallel>, #tpu.dimension_semantics<parallel>], iteration_bounds = array<i64: 1, 1>, scalar_prefetch = 0 : i64, scratch_operands = 0 : i64, tpu.core_type = #tpu.core_type<tc>, window_params = [{transform_indices = @transform_0, window_bounds = array<i64: 16, 256>}, {transform_indices = @transform_1, window_bounds = array<i64: 256, 128>}, {transform_indices = @transform_2, window_bounds = array<i64: 1, 128>}, {transform_indices = @transform_3, window_bounds = array<i64: 16, 128>}]} {
    %c0 = arith.constant 0 : index
    %c0_0 = arith.constant 0 : index
    %0 = vector.load %arg2[%c0, %c0_0] : memref<16x256xf32, #tpu.memory_space<vmem>>, vector<16x256xf32>
    %1 = arith.truncf %0 : vector<16x256xf32> to vector<16x256xbf16>
    %c0_1 = arith.constant 0 : index
    %c0_2 = arith.constant 0 : index
    %2 = vector.load %arg3[%c0_1, %c0_2] : memref<256x128xf32, #tpu.memory_space<vmem>>, vector<256x128xf32>
    %3 = arith.truncf %2 : vector<256x128xf32> to vector<256x128xbf16>
    %cst = arith.constant dense<0.000000e+00> : vector<16x128xf32>
    %4 = tpu.matmul %1, %3, %cst {dimension_numbers = #tpu.dot_dimension_numbers<[1], [0], [0], [1], [0, 0, 1, 1], [], []>} : vector<16x256xbf16>, vector<256x128xbf16>, vector<16x128xf32> -> vector<16x128xf32>
    %c0_3 = arith.constant 0 : index
    %c0_4 = arith.constant 0 : index
    %5 = vector.load %arg4[%c0_3, %c0_4] : memref<1x128xf32, #tpu.memory_space<vmem>>, vector<1x128xf32>
    %6 = vector.broadcast %5 : vector<1x128xf32> to vector<16x128xf32>
    %7 = arith.addf %4, %6 : vector<16x128xf32>
    %8 = arith.truncf %7 : vector<16x128xf32> to vector<16x128xbf16>
    %9 = arith.extf %8 : vector<16x128xbf16> to vector<16x128xf32>
    %c0_5 = arith.constant 0 : index
    %c0_6 = arith.constant 0 : index
    %10 = vector.load %arg5[%c0_5, %c0_6] : memref<16x128xf32, #tpu.memory_space<vmem>>, vector<16x128xf32>
    tpu.vector_store %arg5[%c0_5, %c0_6], %9 {strides = array<i32>} : memref<16x128xf32, #tpu.memory_space<vmem>>, vector<16x128xf32>,
    return
  }
  func.func @transform_0(%arg0: i32, %arg1: i32) -> (i32, i32) {
    %c0_i32 = arith.constant 0 : i32
    %c0_i32_0 = arith.constant 0 : i32
    return %arg0, %c0_i32 : i32, i32
  }
  func.func @transform_1(%arg0: i32, %arg1: i32) -> (i32, i32) {
    %c0_i32 = arith.constant 0 : i32
    %c0_i32_0 = arith.constant 0 : i32
    return %c0_i32, %arg1 : i32, i32
  }
  func.func @transform_2(%arg0: i32, %arg1: i32) -> (i32, i32) {
    %c0_i32 = arith.constant 0 : i32
    %c0_i32_0 = arith.constant 0 : i32
    return %c0_i32, %arg1 : i32, i32
  }
  func.func @transform_3(%arg0: i32, %arg1: i32) -> (i32, i32) {
    %c0_i32 = arith.constant 0 : i32
    return %arg0, %arg1 : i32, i32
  }
}

</mosaic_0001>

<bundles_post_ra>
// kernel: mixed_precision_linear.1
= control target key start
LH: loop header
LB: loop body
LE: loop exit
PB: predicated region body
PF: predicated region fallthrough
CT: control target
= control target key end

     0   :  { %8 = vsyncpa [#allocation3], 0  ;;  %s343_s0 = inlined_call_operand.hbm [shape: f32[16,256], index: 0, kind: input, shape index: {}]   ;;  %s344_s1 = inlined_call_operand.hbm [shape: f32[256,128], index: 1, kind: input, shape index: {}]   ;;  %s345_s2 = inlined_call_operand.vmem [shape: f32[1,128], index: 2, kind: input, shape index: {}]   ;;  %s346_s3 = inlined_call_operand.hbm [shape: f32[16,128], index: 3, kind: output, shape index: {}]  }
   0x1   :  { %9 = vsyncpa [#allocation6], 0 }
   0x2   :  { %10 = vsyncpa [#allocation4], 0  ;;  %s271_s12 = smov [#allocation2]   ;;  %s199_s16 = scalar_lea.hbm %s343_s0, 512 }
   0x3   :  { %s16_s13 = sshll.u32 %s271_s12, 4  ;;  %p200_p0 = scmp.ne.s32.totalorder %s343_s0, %s199_s16  ;;  %s17_s13 = int_to_ptr.vmem [resolvable:$true] %s16_s13 }
   0x4   :  { %p203_p1 = scmp.lt.u32.totalorder %s199_s16, %s343_s0 }
   0x6   :  { %p205_p2 = pnand %p203_p1, %p200_p0 }
   0x8   :  { %208 = shalt.err (!%p205_p2)
}
   0x9   :  { %s209_s21 = scalar_lea.vmem %s17_s13, 512  ;;  %p214_p4 = scmp.lt.s32.totalorder %s17_s13, %s17_s13 }
   0xa   :  { %p210_p3 = scmp.ne.s32.totalorder %s17_s13, %s209_s21  ;;  %p215_p5 = scmp.lt.s32.totalorder %s209_s21, %s209_s21 }
   0xc   :  { %p216_p6 = por %p215_p5, %p214_p4 }
   0xe   :  { %p217_p7 = pnand %p216_p6, %p210_p3 }
  0x10   :  { %220 = shalt.err (!%p217_p7)
}
  0x11   :  { %s272_s22 = smov 256   ;;  %s273_s23 = smov 16  }
  0x12   :  { %22 = dma.hbm_to_vmem [thread:$0]  %s343_s0, 512, %s17_s13, [#allocation3], %s272_s22, %s272_s22, %s273_s23  }
  0x13   :  { %s274_s26 = smov [#allocation5]   ;;  %s221_s30 = scalar_lea.hbm %s344_s1, 4096 }
  0x14   :  { %s28_s27 = sshll.u32 %s274_s26, 4  ;;  %p222_p8 = scmp.ne.s32.totalorder %s344_s1, %s221_s30  ;;  %s29_s27 = int_to_ptr.vmem [resolvable:$true] %s28_s27 }
  0x15   :  { %p225_p9 = scmp.lt.u32.totalorder %s221_s30, %s344_s1 }
  0x17   :  { %p227_p10 = pnand %p225_p9, %p222_p8 }
  0x19   :  { %230 = shalt.err (!%p227_p10)
}
  0x1a   :  { %s231_s8 = scalar_lea.vmem %s29_s27, 4096  ;;  %p236_p12 = scmp.lt.s32.totalorder %s29_s27, %s29_s27 }
  0x1b   :  { %p232_p11 = scmp.ne.s32.totalorder %s29_s27, %s231_s8  ;;  %p237_p13 = scmp.lt.s32.totalorder %s231_s8, %s231_s8 }
  0x1d   :  { %p238_p0 = por %p237_p13, %p236_p12 }
  0x1f   :  { %p239_p1 = pnand %p238_p0, %p232_p11 }
  0x21   :  { %242 = shalt.err (!%p239_p1)
}
  0x22   :  { %s275_s0 = smov 128   ;;  %s276_s9 = smov 8  }
  0x23   :  { %34 = dma.hbm_to_vmem [thread:$0]  %s344_s1, 4096, %s29_s27, [#allocation6], %s275_s0, %s275_s0, %s276_s9  }
  0x24   :  { %265 = dma.done.wait [#allocation3], 512  }
  0x25   :  { %266 = vsyncadd [#allocation3], 4294966784 }
  0x26   :  { %267 = dma.done.wait [#allocation6], 4096  }
  0x27   :  { %268 = vsyncadd [#allocation6], 4294963200  ;;  %v66_v0 = vld [vmem:[#allocation5 + $0x80] sm:$0xff]  ;;  %v67_v1 = vld [vmem:[#allocation5 + $0x88] sm:$0xff]  ;;  %s277_s13 = smov [#allocation7]  }
  0x28   :  { %v50_v2 = vld [vmem:[#allocation5] sm:$0xff]  ;;  %v90_v3 = vpack.c.bf16 %v67_v1, %v66_v0  ;;  %v51_v4 = vld [vmem:[#allocation5 + $0x8] sm:$0xff]  ;;  %v68_v5 = vld [vmem:[#allocation5 + $0x90] sm:$0xff]  ;;  %s156_s14 = sshll.u32 %s277_s13, 4  ;;  %s157_s14 = int_to_ptr.vmem [resolvable:$true] %s156_s14 }
  0x29   :  { %v69_v6 = vld [vmem:[#allocation5 + $0x98] sm:$0xff]  ;;  %v82_v7 = vpack.c.bf16 %v51_v4, %v50_v2  ;;  %v52_v9 = vld [vmem:[#allocation5 + $0x10] sm:$0xff]  ;;  %v70_v11 = vld [vmem:[#allocation5 + $0xa0] sm:$0xff]  ;;  %s243_s15 = scalar_lea.vmem %s157_s14, 256  ;;  %p248_p3 = scmp.lt.s32.totalorder %s157_s14, %s157_s14 }
  0x2a   :  { %v91_v8 = vpack.c.bf16 %v69_v6, %v68_v5  ;;  %v53_v10 = vld [vmem:[#allocation5 + $0x18] sm:$0xff]  ;;  %170 = vmatprep.subr.bf16.mxu0 %v90_v3  ;;  %v71_v12 = vld [vmem:[#allocation5 + $0xa8] sm:$0xff]  ;;  %v54_v15 = vld [vmem:[#allocation5 + $0x20] sm:$0xff]  ;;  %p244_p2 = scmp.ne.s32.totalorder %s157_s14, %s243_s15  ;;  %p249_p4 = scmp.lt.s32.totalorder %s243_s15, %s243_s15 }
  0x2b   :  { %171 = vmatpush3.bf16.msra.mxu0 %v82_v7  ;;  %v83_v13 = vpack.c.bf16 %v53_v10, %v52_v9  ;;  %v92_v14 = vpack.c.bf16 %v71_v12, %v70_v11  ;;  %v55_v16 = vld [vmem:[#allocation5 + $0x28] sm:$0xff]  ;;  %v72_v17 = vld [vmem:[#allocation5 + $0xb0] sm:$0xff]  ;;  %v73_v18 = vld [vmem:[#allocation5 + $0xb8] sm:$0xff] }
  0x2c   :  { %172 = vmatprep.subr.bf16.mxu0 %v91_v8  ;;  %v84_v19 = vpack.c.bf16 %v55_v16, %v54_v15  ;;  %v93_v20 = vpack.c.bf16 %v73_v18, %v72_v17  ;;  %v56_v21 = vld [vmem:[#allocation5 + $0x30] sm:$0xff]  ;;  %v57_v22 = vld [vmem:[#allocation5 + $0x38] sm:$0xff]  ;;  %v74_v23 = vld [vmem:[#allocation5 + $0xc0] sm:$0xff]  ;;  %p250_p5 = por %p249_p4, %p248_p3 }
  0x2d   :  { %v75_v24 = vld [vmem:[#allocation5 + $0xc8] sm:$0xff]  ;;  %v47_v26 = vld [vmem:[#allocation2 + $0x18] sm:$0xff]  ;;  %v85_v27 = vpack.c.bf16 %v57_v22, %v56_v21  ;;  %v58_v30 = vld [vmem:[#allocation5 + $0x40] sm:$0xff] }
  0x2e   :  { %v45_v25 = vld [vmem:[#allocation2 + $0x8] sm:$0xff]  ;;  %v94_v29 = vpack.c.bf16 %v75_v24, %v74_v23  ;;  %v76_v32 = vld [vmem:[#allocation5 + $0xd0] sm:$0xff]  ;;  %v77_v33 = vld [vmem:[#allocation5 + $0xd8] sm:$0xff]  ;;  %p251_p6 = pnand %p250_p5, %p244_p2 }
  0x2f   :  { %173 = vmatpush3.bf16.msra.mxu0 %v83_v13  ;;  %v49_v28 = vpack.c.bf16 %v47_v26, %v45_v25  ;;  %v59_v31 = vld [vmem:[#allocation5 + $0x48] sm:$0xff]  ;;  %v95_v35 = vpack.c.bf16 %v77_v33, %v76_v32  ;;  %v60_v36 = vld [vmem:[#allocation5 + $0x50] sm:$0xff]  ;;  %v61_v37 = vld [vmem:[#allocation5 + $0x58] sm:$0xff] }
  0x30   :  { %174 = vmatprep.subr.bf16.mxu0 %v92_v14  ;;  %v86_v34 = vpack.c.bf16 %v59_v31, %v58_v30  ;;  %v78_v38 = vld [vmem:[#allocation5 + $0xe0] sm:$0xff]  ;;  %v79_v39 = vld [vmem:[#allocation5 + $0xe8] sm:$0xff]  ;;  %v87_v40 = vpack.c.bf16 %v61_v37, %v60_v36  ;;  %v80_v44 = vld [vmem:[#allocation5 + $0xf0] sm:$0xff] }
  0x31   :  { %137 = vmatprep.mubr.bf16.mxu0 %v49_v28  ;;  %v96_v41 = vpack.c.bf16 %v79_v39, %v78_v38  ;;  %v62_v42 = vld [vmem:[#allocation5 + $0x60] sm:$0xff]  ;;  %v63_v43 = vld [vmem:[#allocation5 + $0x68] sm:$0xff]  ;;  %v81_v45 = vld [vmem:[#allocation5 + $0xf8] sm:$0xff] }
  0x32   :  { %v88_v46 = vpack.c.bf16 %v63_v43, %v62_v42  ;;  %v97_v47 = vpack.c.bf16 %v81_v45, %v80_v44  ;;  %v64_v48 = vld [vmem:[#allocation5 + $0x70] sm:$0xff]  ;;  %v65_v49 = vld [vmem:[#allocation5 + $0x78] sm:$0xff]  ;;  %v44_v51 = vld [vmem:[#allocation2] sm:$0xff] }
  0x33   :  { %175 = vmatpush3.bf16.msra.mxu0 %v84_v19  ;;  %v89_v50 = vpack.c.bf16 %v65_v49, %v64_v48  ;;  %v46_v52 = vld [vmem:[#allocation2 + $0x10] sm:$0xff]  ;;  %v169_v58 = vld [vmem:[%s345_s2] ss:$0 sm:$0xff] }
  0x34   :  { %176 = vmatprep.subr.bf16.mxu0 %v93_v20  ;;  %v48_v53 = vpack.c.bf16 %v46_v52, %v44_v51 }
  0x37   :  { %177 = vmatpush3.bf16.msra.mxu0 %v85_v27 }
  0x38   :  { %178 = vmatprep.subr.bf16.mxu0 %v94_v29 }
  0x3b   :  { %179 = vmatpush3.bf16.msra.mxu0 %v86_v34 }
  0x3c   :  { %180 = vmatprep.subr.bf16.mxu0 %v95_v35 }
  0x3f   :  { %181 = vmatpush3.bf16.msra.mxu0 %v87_v40 }
  0x40   :  { %182 = vmatprep.subr.bf16.mxu0 %v96_v41 }
  0x43   :  { %183 = vmatpush3.bf16.msra.mxu0 %v88_v46 }
  0x44   :  { %184 = vmatprep.subr.bf16.mxu0 %v97_v47 }
  0x47   :  { %185 = vmatpush3.bf16.msra.mxu0 %v89_v50 }
  0x4a   :  { %138 = vmatmul.mubr.bf16.vlgmr.msra.gmra.mrb[0].mxu0 %v48_v53 }
 0x11d   :  { %v186_v54 = vpop.f32.mrb[0].mxu0 }
 0x11e   :  { %v187_v55 = vpop.f32.mrb[1].mxu0 }
 0x11f   :  { %v188_v56 = vadd.f32 %v187_v55, %v186_v54  ;;  %v189_v57 = vpop.f32.mrb[2].mxu0 }
 0x120   :  { %v190_v59 = vpop.f32.mrb[3].mxu0 }
 0x121   :  { %v191_v60 = vadd.f32 %v190_v59, %v189_v57  ;;  %v140_v61 = vadd.f32 %v188_v56, %v169_v58 }
 0x123   :  { %v143_v62 = vadd.f32 %v191_v60, %v169_v58 }
 0x125   :  { %v146_v63 = vpack.c.bf16 %v143_v62, %v140_v61 }
 0x127   :  { %v147_v0 = vunpack.c.l.bf16 %v146_v63  ;;  %v148_v1 = vunpack.c.h.bf16 %v146_v63 }
 0x129   :  { %149 = vst [vmem:[#allocation7] sm:$0xff] %v147_v0  ;;  %150 = vst [vmem:[#allocation7 + $0x8] sm:$0xff] %v148_v1 }
 0x12a   :  { %254 = shalt.err (!%p251_p6)
}
 0x12b   :  { %s255_s17 = scalar_lea.hbm %s346_s3, 256 }
 0x12c   :  { %p256_p7 = scmp.ne.s32.totalorder %s346_s3, %s255_s17  ;;  %p259_p8 = scmp.lt.u32.totalorder %s255_s17, %s346_s3 }
 0x12e   :  { %p261_p9 = pnand %p259_p8, %p256_p7 }
 0x130   :  { %264 = shalt.err (!%p261_p9)
}
 0x131   :  { %162 = dma.vmem_to_hbm [thread:$0]  %s157_s14, 256, %s346_s3, [#allocation4], %s275_s0, %s275_s0, %s276_s9  }
 0x132   :  { %269 = dma.done.wait [#allocation4], 256  }
 0x133   :  { %270 = vsyncadd [#allocation4], 4294967040 }
 0x134   :  { %166 = vsyncpa [#allocation3], 1 }
 0x135   :  { %167 = vsyncpa [#allocation6], 1 }
 0x136   :  { %168 = vsyncpa [#allocation4], 1 }

</bundles_post_ra>
